<compile_context>
chip_gen: v7x
topology: tpu7x:2x2x1
jax: 0.10.0
libtpu: 0.0.40
codegen_flags: <defaults>
</compile_context>

<pallas_src>
import numpy as np

import jax
import jax.numpy as jnp
from jax import lax
from jax.experimental import pallas as pl
from jax.experimental.pallas import tpu as pltpu

_LANES = 128
_SUBLANES = 8
_MAX_BLOCK_ROWS = 4096          # 4096 x 128 x 4 B = 2 MiB per output block
_SPLIT_THRESHOLD_ROWS = 512     # above this, use >= 2 blocks (v7x has 2 TCs)


def _round_up(a, b):
    return -(-a // b) * b


def _bits_to_uniform(bits_u32, out_dtype):
    """23 random bits -> float in [1,2) via mantissa bit-pack -> [-1,1)."""
    mant = bits_u32 >> jnp.uint32(9)                    # keep 23 bits
    fbits = mant | jnp.uint32(0x3F800000)               # exponent of 1.0
    f = pltpu.bitcast(fbits, jnp.float32)               # uniform in [1.0, 2.0)
    return (f * jnp.float32(2.0) - jnp.float32(3.0)).astype(out_dtype)  # [-1,1)


def _uniform_kernel_hw(seed_ref, o_ref):
    """Hardware-PRNG path (Mosaic TPU): ~4 VPU ops/element, store-bound."""
    pltpu.prng_seed(seed_ref[0], pl.program_id(0))      # per-block reseed
    bits = pltpu.prng_random_bits(o_ref.shape)
    if bits.dtype != jnp.uint32:
        bits = pltpu.bitcast(bits, jnp.uint32)
    o_ref[...] = _bits_to_uniform(bits, o_ref.dtype)


def _uniform_kernel_hash(seed_ref, o_ref):
    """Portable uint32 counter-hash fallback (lowbias32-style finalizer)."""
    block_rows, lanes = o_ref.shape
    golden = jnp.uint32(0x9E3779B9)
    # Scalar part of the counter (seed + this block's global offset) folds on
    # the scalar unit; the vector side is 2 muls + 2 adds.
    base = seed_ref[0].astype(jnp.uint32) + (
        pl.program_id(0).astype(jnp.uint32)
        * jnp.uint32(block_rows * lanes) * golden)
    row = lax.broadcasted_iota(jnp.uint32, (block_rows, lanes), 0)
    col = lax.broadcasted_iota(jnp.uint32, (block_rows, lanes), 1)
    x = base + row * (jnp.uint32(lanes) * golden) + col * golden
    x = x ^ (x >> jnp.uint32(16))
    x = x * jnp.uint32(0x7FEB352D)
    x = x ^ (x >> jnp.uint32(15))
    x = x * jnp.uint32(0x846CA68B)
    x = x ^ (x >> jnp.uint32(16))
    o_ref[...] = _bits_to_uniform(x, o_ref.dtype)


def uniform_policy_continuous_forward(x, seed, action_shape, *, use_hw_prng=None):
    """Pallas equivalent of UniformPolicyContinuous.forward.

    `x` is accepted (to mirror the nn.Module signature) but ignored, exactly as
    in the PyTorch module.  `seed` makes sampling deterministic (the torch
    version relies on numpy's global RNG state, which has no JAX equivalent).
    """
    del x  # observation is unused by this policy

    if isinstance(action_shape, int):
        action_shape = (action_shape,)
    action_shape = tuple(int(d) for d in action_shape)
    n = int(np.prod(action_shape)) if action_shape else 1
    n = max(n, 1)

    if use_hw_prng is None:
        use_hw_prng = jax.default_backend() == "tpu"
    kernel = _uniform_kernel_hw if use_hw_prng else _uniform_kernel_hash

    # Lane-dense flattened layout: (rows8, 128) f32, rows8 a sublane multiple.
    rows = max(1, -(-n // _LANES))
    rows8 = _round_up(rows, _SUBLANES)

    if rows8 <= _SPLIT_THRESHOLD_ROWS:
        block_rows = rows8                                   # one block (launch-bound)
    elif rows8 <= 2 * _MAX_BLOCK_ROWS:
        block_rows = _round_up(-(-rows8 // 2), _SUBLANES)    # 2 blocks -> both v7x TCs
    else:
        block_rows = _MAX_BLOCK_ROWS                         # ~2 MiB blocks
    num_blocks = -(-rows8 // block_rows)                     # last block may be partial

    seed_arr = jnp.asarray([seed], dtype=jnp.int32)
    out_bytes = rows8 * _LANES * 4

    padded = pl.pallas_call(
        kernel,
        out_shape=jax.ShapeDtypeStruct((rows8, _LANES), jnp.float32),
        grid=(num_blocks,),
        in_specs=[pl.BlockSpec(memory_space=pltpu.MemorySpace.SMEM)],
        out_specs=pl.BlockSpec((block_rows, _LANES), lambda i: (i, 0)),
        compiler_params=pltpu.CompilerParams(
            dimension_semantics=("parallel",)),
        cost_estimate=pl.CostEstimate(
            flops=6 * rows8 * _LANES, transcendentals=0,
            bytes_accessed=out_bytes + 4),
    )(seed_arr)

    flat = padded.reshape(-1)
    if flat.shape[0] != n:
        flat = flat[:n]     # only for non-128-aligned sizes (extra copy)
    return flat.reshape(action_shape)


if __name__ == "__main__":
    key = jax.random.PRNGKey(0)

    # Small module-consistent shapes: batch of 2 observations (dim 32, ignored),
    # the policy emits actions of shape (2, 8).
    action_shape = (2, 8)
    x = jax.random.normal(key, (2, 32), dtype=jnp.float32)
    seed = 1234  # deterministic stand-in for numpy's global RNG state

    actions = uniform_policy_continuous_forward(x, seed, action_shape)
    actions = jax.block_until_ready(actions)

    assert actions.shape == action_shape, actions.shape
    assert actions.dtype == jnp.float32, actions.dtype
    a = np.asarray(actions)
    assert np.all(a >= -1.0) and np.all(a < 1.0), (a.min(), a.max())
    assert np.unique(a).size > 1, "degenerate RNG output"

    # Determinism: same seed -> identical sample.
    actions2 = jax.block_until_ready(
        uniform_policy_continuous_forward(x, seed, action_shape))
    assert np.array_equal(np.asarray(actions2), a), "non-deterministic output"

    # A 128-aligned multi-row shape exercising the no-slice (zero-copy) path.
    big_shape = (24, 128)  # n = 3072 -> rows = 24, no wrapper-side slice
    big = jax.block_until_ready(
        uniform_policy_continuous_forward(x, seed + 1, big_shape))
    b = np.asarray(big)
    assert big.shape == big_shape, big.shape
    assert np.all(b >= -1.0) and np.all(b < 1.0), (b.min(), b.max())
    assert abs(float(b.mean())) < 0.2, float(b.mean())  # roughly centered on 0

    print("KERNEL_OK")
</pallas_src>

<mosaic_0001>
module attributes {stable_mosaic.version = 11 : i64} {
  func.func @_uniform_kernel_hash(%arg0: i32, %arg1: memref<1xi32, #tpu.memory_space<smem>>, %arg2: memref<8x128xf32, #tpu.memory_space<vmem>>) attributes {dimension_semantics = [#tpu.dimension_semantics<parallel>], iteration_bounds = array<i64: 1>, scalar_prefetch = 0 : i64, scratch_operands = 0 : i64, tpu.core_type = #tpu.core_type<tc>, window_params = [{transform_indices = @transform_0, window_bounds = array<i64: 1>}, {transform_indices = @transform_1, window_bounds = array<i64: 8, 128>}]} {
    %c0 = arith.constant 0 : index
    %0 = memref.load %arg1[%c0] : memref<1xi32, #tpu.memory_space<smem>>
    %c1024_i32 = arith.constant 1024 : i32
    %1 = arith.muli %arg0, %c1024_i32 : i32
    %c-1640531527_i32 = arith.constant -1640531527 : i32
    %2 = arith.muli %1, %c-1640531527_i32 : i32
    %3 = arith.addi %0, %2 : i32
    %4 = tpu.iota {dimensions = array<i32: 0>} : vector<8x128xi32>
    %5 = tpu.iota {dimensions = array<i32: 1>} : vector<8x128xi32>
    %c128_i32 = arith.constant 128 : i32
    %c-1640531527_i32_0 = arith.constant -1640531527 : i32
    %6 = arith.muli %c128_i32, %c-1640531527_i32_0 : i32
    %7 = vector.broadcast %6 : i32 to vector<8x128xi32>
    %8 = arith.muli %4, %7 : vector<8x128xi32>
    %9 = vector.broadcast %3 : i32 to vector<8x128xi32>
    %10 = arith.addi %9, %8 : vector<8x128xi32>
    %c-1640531527_i32_1 = arith.constant -1640531527 : i32
    %11 = vector.broadcast %c-1640531527_i32_1 : i32 to vector<8x128xi32>
    %12 = arith.muli %5, %11 : vector<8x128xi32>
    %13 = arith.addi %10, %12 : vector<8x128xi32>
    %c16_i32 = arith.constant 16 : i32
    %14 = vector.broadcast %c16_i32 : i32 to vector<8x128xi32>
    %15 = arith.shrui %13, %14 : vector<8x128xi32>
    %16 = arith.xori %13, %15 : vector<8x128xi32>
    %c2146121005_i32 = arith.constant 2146121005 : i32
    %17 = vector.broadcast %c2146121005_i32 : i32 to vector<8x128xi32>
    %18 = arith.muli %16, %17 : vector<8x128xi32>
    %c15_i32 = arith.constant 15 : i32
    %19 = vector.broadcast %c15_i32 : i32 to vector<8x128xi32>
    %20 = arith.shrui %18, %19 : vector<8x128xi32>
    %21 = arith.xori %18, %20 : vector<8x128xi32>
    %c-2073254261_i32 = arith.constant -2073254261 : i32
    %22 = vector.broadcast %c-2073254261_i32 : i32 to vector<8x128xi32>
    %23 = arith.muli %21, %22 : vector<8x128xi32>
    %c16_i32_2 = arith.constant 16 : i32
    %24 = vector.broadcast %c16_i32_2 : i32 to vector<8x128xi32>
    %25 = arith.shrui %23, %24 : vector<8x128xi32>
    %26 = arith.xori %23, %25 : vector<8x128xi32>
    %c9_i32 = arith.constant 9 : i32
    %27 = vector.broadcast %c9_i32 : i32 to vector<8x128xi32>
    %28 = arith.shrui %26, %27 : vector<8x128xi32>
    %c1065353216_i32 = arith.constant 1065353216 : i32
    %29 = vector.broadcast %c1065353216_i32 : i32 to vector<8x128xi32>
    %30 = arith.ori %28, %29 : vector<8x128xi32>
    %31 = tpu.bitcast %30 : vector<8x128xi32> -> vector<8x128xf32>
    %cst = arith.constant 2.000000e+00 : f32
    %32 = vector.broadcast %cst : f32 to vector<8x128xf32>
    %33 = arith.mulf %31, %32 : vector<8x128xf32>
    %cst_3 = arith.constant 3.000000e+00 : f32
    %34 = vector.broadcast %cst_3 : f32 to vector<8x128xf32>
    %35 = arith.subf %33, %34 : vector<8x128xf32>
    %c0_4 = arith.constant 0 : index
    %c0_5 = arith.constant 0 : index
    %36 = vector.load %arg2[%c0_4, %c0_5] : memref<8x128xf32, #tpu.memory_space<vmem>>, vector<8x128xf32>
    tpu.vector_store %arg2[%c0_4, %c0_5], %35 {strides = array<i32>} : memref<8x128xf32, #tpu.memory_space<vmem>>, vector<8x128xf32>,
    return
  }
  func.func @transform_0(%arg0: i32) -> i32 {
    %c0_i32 = arith.constant 0 : i32
    %c0_i32_0 = arith.constant 0 : i32
    return %c0_i32 : i32
  }
  func.func @transform_1(%arg0: i32) -> (i32, i32) {
    %c0_i32 = arith.constant 0 : i32
    %c0_i32_0 = arith.constant 0 : i32
    return %arg0, %c0_i32 : i32, i32
  }
}

</mosaic_0001>

<bundles_post_ra>
// kernel: tpu_custom_call.1
= control target key start
LH: loop header
LB: loop body
LE: loop exit
PB: predicated region body
PF: predicated region fallthrough
CT: control target
= control target key end

     0   :  { %v13_v0 = vlaneseq  ;;  %s102_s0 = inlined_call_operand.<no memory space> [shape: s32[1], index: 0, kind: input, shape index: {}]   ;;  %s103_s1 = inlined_call_operand.hbm [shape: f32[8,128], index: 1, kind: output, shape index: {}]  }
   0x1   :  { %7 = vsyncpa [#allocation4], 0  ;;  %v18_v3 = vstv %s102_s0  ;;  %s76_s8 = smov [#allocation3]  }
   0x2   :  { %v14_v1 = vshrl.u32 %v13_v0, 7  ;;  %v16_v2 = vand.u32 127, %v13_v0  ;;  %s42_s9 = sshll.u32 %s76_s8, 4  ;;  %s43_s9 = int_to_ptr.vmem [resolvable:$true] %s42_s9 }
   0x3   :  { %s52_s0 = scalar_lea.vmem %s43_s9, 128  ;;  %p57_p1 = scmp.lt.s32.totalorder %s43_s9, %s43_s9 }
   0x4   :  { %v17_v4 = vmul.u32 465362048, %v14_v1  ;;  %v20_v5 = vmul.u32 2654435769, %v16_v2  ;;  %p53_p0 = scmp.ne.s32.totalorder %s43_s9, %s52_s0  ;;  %p58_p2 = scmp.lt.s32.totalorder %s52_s0, %s52_s0 }
   0x6   :  { %v19_v6 = vadd.s32 %v18_v3, %v17_v4  ;;  %p59_p3 = por %p58_p2, %p57_p1 }
   0x8   :  { %v21_v7 = vadd.s32 %v20_v5, %v19_v6  ;;  %p60_p4 = pnand %p59_p3, %p53_p0 }
   0xa   :  { %v22_v8 = vshrl.u32 %v21_v7, 16 }
   0xc   :  { %v23_v9 = vxor.u32 %v22_v8, %v21_v7 }
   0xe   :  { %v24_v10 = vmul.u32 2146121005, %v23_v9 }
  0x10   :  { %v25_v11 = vshrl.u32 %v24_v10, 15 }
  0x12   :  { %v26_v12 = vxor.u32 %v25_v11, %v24_v10 }
  0x14   :  { %v27_v13 = vmul.u32 2221713035, %v26_v12 }
  0x16   :  { %v28_v14 = vshrl.u32 %v27_v13, 16 }
  0x18   :  { %v29_v15 = vxor.u32 %v28_v14, %v27_v13 }
  0x1a   :  { %v30_v16 = vshrl.u32 %v29_v15, 9 }
  0x1c   :  { %v31_v17 = vor.u32 1065353216, %v30_v16 }
  0x1e   :  { %v33_v18 = vmul.f32 2.0, %v31_v17 }
  0x20   :  { %v50_v19 = vadd.f32 -3.0, %v33_v18 }
  0x22   :  { %35 = vst [vmem:[#allocation3] sm:$0xff] %v50_v19 }
  0x23   :  { %63 = shalt.err (!%p60_p4)
}
  0x24   :  { %s64_s12 = scalar_lea.hbm %s103_s1, 128 }
  0x25   :  { %p65_p5 = scmp.ne.s32.totalorder %s103_s1, %s64_s12  ;;  %p68_p6 = scmp.lt.u32.totalorder %s64_s12, %s103_s1 }
  0x27   :  { %p70_p7 = pnand %p68_p6, %p65_p5 }
  0x29   :  { %73 = shalt.err (!%p70_p7)
}
  0x2a   :  { %45 = dma.vmem_to_hbm [thread:$0]  %s43_s9, 128, %s103_s1, [#allocation4]  }
  0x2b   :  { %74 = dma.done.wait [#allocation4], 128  }
  0x2c   :  { %75 = vsyncadd [#allocation4], 4294967168 }
  0x2d   :  { %49 = vsyncpa [#allocation4], 1 }

</bundles_post_ra>
